<compile_context>
chip_gen: v5e
topology: v5e:2x2
jax: 0.10.0
libtpu: 0.0.40
codegen_flags: <defaults>
</compile_context>

<pallas_src>
import functools

import jax
import jax.numpy as jnp
from jax import lax
from jax.experimental import pallas as pl
from jax.experimental.pallas import tpu as pltpu

BN_EPS = 1e-5


# ---------------------------------------------------------------------------
# Generation-aware knobs
# ---------------------------------------------------------------------------
def _tpu_budget():
    """(pointwise tile rows, scoped VMEM limit bytes) per TPU generation."""
    try:
        cap = int(pltpu.get_tpu_info().vmem_capacity_bytes)
    except Exception:
        cap = 64 * 2**20
    if cap >= 128 * 2**20:           # v5e / v6e
        return 1024, 64 * 2**20
    # v7x-class (64 MiB physical): keep 1024-row tiles; bf16 intermediates and
    # the fused downsample keep worst-case ResNet-50 tiles under ~48 MiB.
    return 1024, 48 * 2**20


def _pick_row_tile(H, target=16):
    """Largest divisor of H that is <= target, preferring >= 2 row tiles so
    the row grid axis can be split across TensorCores (v7x megacore)."""
    cands = [t for t in range(1, H + 1) if H % t == 0 and t <= target]
    multi = [t for t in cands if H // t >= 2 and t >= 4]
    if multi:
        return max(multi)
    return max(cands) if cands else H


def _round_tile(M, tile_m):
    tile_m = min(tile_m, M)
    if tile_m != M and tile_m % 8:
        tile_m = max(8, (tile_m // 8) * 8)
    return tile_m


# ---------------------------------------------------------------------------
# Pallas kernels
# ---------------------------------------------------------------------------
def _pw_conv_bn_kernel(x_ref, w_ref, s_ref, b_ref, o_ref, *, relu):
    # 1x1 conv == channel matmul (bf16 in, f32 acc), fused BN affine (+ReLU).
    a = x_ref[...].astype(jnp.bfloat16)
    y = jnp.dot(a, w_ref[...], preferred_element_type=jnp.float32)
    y = y * s_ref[...] + b_ref[...]
    if relu:
        y = jnp.maximum(y, 0.0)
    o_ref[...] = y.astype(o_ref.dtype)


def _pw_conv_bn_add_relu_kernel(h_ref, w_ref, s_ref, b_ref, r_ref, o_ref):
    # conv3 (1x1) + BN + identity residual add + ReLU, f32 epilogue.
    y = jnp.dot(h_ref[...].astype(jnp.bfloat16), w_ref[...],
                preferred_element_type=jnp.float32)
    y = y * s_ref[...] + b_ref[...]
    y = y + r_ref[...].astype(jnp.float32)
    o_ref[...] = jnp.maximum(y, 0.0).astype(o_ref.dtype)


def _pw_conv_bn_ds_add_relu_kernel(h_ref, x_ref, w3_ref, s3_ref, b3_ref,
                                   wd_ref, sd_ref, bd_ref, o_ref):
    # conv3 (1x1) + BN + FUSED downsample 1x1 conv + BN + add + ReLU.
    y = jnp.dot(h_ref[...].astype(jnp.bfloat16), w3_ref[...],
                preferred_element_type=jnp.float32)
    y = y * s3_ref[...] + b3_ref[...]
    idn = jnp.dot(x_ref[...].astype(jnp.bfloat16), wd_ref[...],
                  preferred_element_type=jnp.float32)
    idn = idn * sd_ref[...] + bd_ref[...]
    o_ref[...] = jnp.maximum(y + idn, 0.0).astype(o_ref.dtype)


def _conv3x3_bn_relu_kernel(x_ref, w_ref, s_ref, b_ref, o_ref, slab_ref,
                            *, TH, W, Cin, Cout):
    # x_ref   : (1, H, W, Cin) UNPADDED image (bf16) — constant block across
    #           the row-tile grid axis, so it is DMA'd once per image.
    # w_ref   : (3, 3*Cin, Cout) bf16 — ky-major, kx folded into contraction.
    # s_ref/b_ref : (1, Cout) f32 folded-BN scale / bias.
    # o_ref   : (1, TH, W, Cout) output row slab.
    # slab_ref: (TH+2, W+2, Cin) bf16 VMEM scratch (halo-padded input slab).
    r = pl.program_id(1)
    row0 = r * TH
    if TH % 8 == 0:
        row0 = pl.multiple_of(row0, 8)

    dt = slab_ref.dtype
    # Left / right halo columns are always zero (small masked sublane stores).
    slab_ref[:, pl.ds(0, 1), :] = jnp.zeros((TH + 2, 1, Cin), dt)
    slab_ref[:, pl.ds(W + 1, 1), :] = jnp.zeros((TH + 2, 1, Cin), dt)

    # Interior rows of this output row tile.
    slab_ref[pl.ds(1, TH), pl.ds(1, W), :] = x_ref[0, pl.ds(row0, TH), :, :]

    # Top halo row: previous image row, or zero on the first tile.
    @pl.when(r > 0)
    def _():
        slab_ref[pl.ds(0, 1), pl.ds(1, W), :] = \
            x_ref[0, pl.ds(row0 - 1, 1), :, :]

    @pl.when(r == 0)
    def _():
        slab_ref[pl.ds(0, 1), pl.ds(1, W), :] = jnp.zeros((1, W, Cin), dt)

    # Bottom halo row: next image row, or zero on the last tile.
    @pl.when(r < pl.num_programs(1) - 1)
    def _():
        slab_ref[pl.ds(TH + 1, 1), pl.ds(1, W), :] = \
            x_ref[0, pl.ds(row0 + TH, 1), :, :]

    @pl.when(r == pl.num_programs(1) - 1)
    def _():
        slab_ref[pl.ds(TH + 1, 1), pl.ds(1, W), :] = jnp.zeros((1, W, Cin), dt)

    # 3 matmuls with K = 3*Cin (kx folded into the contraction dim);
    # ky partial sums accumulate in a local (register) f32 value.
    acc = None
    for ky in range(3):
        rows = slab_ref[pl.ds(ky, TH), :, :]            # (TH, W+2, Cin)
        patch = jnp.concatenate(
            [rows[:, 0:W, :], rows[:, 1:W + 1, :], rows[:, 2:W + 2, :]],
            axis=-1).reshape(TH * W, 3 * Cin)
        contrib = jnp.dot(patch, w_ref[ky],
                          preferred_element_type=jnp.float32)
        acc = contrib if acc is None else acc + contrib

    y = acc * s_ref[...] + b_ref[...]
    y = jnp.maximum(y, 0.0)
    o_ref[...] = y.reshape(1, TH, W, Cout).astype(o_ref.dtype)


# ---------------------------------------------------------------------------
# pallas_call wrappers
# ---------------------------------------------------------------------------
def _pointwise(x2d, w, scale, bias, *, relu, out_dtype=None,
               tile_m=1024, vmem_limit=None):
    """Fused 1x1 conv + BN (+ReLU) on a (M, Cin) view."""
    M, Cin = x2d.shape
    Cout = w.shape[1]
    out_dtype = out_dtype or x2d.dtype
    tile_m = _round_tile(M, tile_m)
    grid = (pl.cdiv(M, tile_m),)

    wb = w.astype(jnp.bfloat16)
    s2 = scale.reshape(1, Cout).astype(jnp.float32)
    b2 = bias.reshape(1, Cout).astype(jnp.float32)

    x_spec = pl.BlockSpec((tile_m, Cin), lambda i: (i, 0))
    w_spec = pl.BlockSpec((Cin, Cout), lambda i: (0, 0))     # constant block
    v_spec = pl.BlockSpec((1, Cout), lambda i: (0, 0))       # constant block
    o_spec = pl.BlockSpec((tile_m, Cout), lambda i: (i, 0))

    return pl.pallas_call(
        functools.partial(_pw_conv_bn_kernel, relu=relu),
        out_shape=jax.ShapeDtypeStruct((M, Cout), out_dtype),
        grid_spec=pltpu.PrefetchScalarGridSpec(
            num_scalar_prefetch=0, grid=grid,
            in_specs=[x_spec, w_spec, v_spec, v_spec],
            out_specs=o_spec),
        compiler_params=pltpu.CompilerParams(
            dimension_semantics=("parallel",),
            vmem_limit_bytes=vmem_limit),
    )(x2d, wb, s2, b2)


def _tail_add(h2d, w3, s3, b3, res2d, *, out_dtype, tile_m, vmem_limit):
    """conv3 (1x1) + bn3 + identity residual add + ReLU."""
    M, width = h2d.shape
    Cout = w3.shape[1]
    tile_m = _round_tile(M, tile_m)
    grid = (pl.cdiv(M, tile_m),)

    w3b = w3.astype(jnp.bfloat16)
    s3v = s3.reshape(1, Cout).astype(jnp.float32)
    b3v = b3.reshape(1, Cout).astype(jnp.float32)

    h_spec = pl.BlockSpec((tile_m, width), lambda i: (i, 0))
    w_spec = pl.BlockSpec((width, Cout), lambda i: (0, 0))
    v_spec = pl.BlockSpec((1, Cout), lambda i: (0, 0))
    r_spec = pl.BlockSpec((tile_m, Cout), lambda i: (i, 0))
    o_spec = pl.BlockSpec((tile_m, Cout), lambda i: (i, 0))

    return pl.pallas_call(
        _pw_conv_bn_add_relu_kernel,
        out_shape=jax.ShapeDtypeStruct((M, Cout), out_dtype),
        grid_spec=pltpu.PrefetchScalarGridSpec(
            num_scalar_prefetch=0, grid=grid,
            in_specs=[h_spec, w_spec, v_spec, v_spec, r_spec],
            out_specs=o_spec),
        compiler_params=pltpu.CompilerParams(
            dimension_semantics=("parallel",),
            vmem_limit_bytes=vmem_limit),
    )(h2d, w3b, s3v, b3v, res2d)


def _tail_fused_downsample(h2d, x2d, w3, s3, b3, wd, sd, bd, *,
                           out_dtype, tile_m, vmem_limit):
    """conv3 (1x1) + bn3 + FUSED downsample (1x1 conv + bn) + add + ReLU."""
    M, width = h2d.shape
    Cin = x2d.shape[1]
    Cout = w3.shape[1]
    tile_m = _round_tile(M, tile_m)
    grid = (pl.cdiv(M, tile_m),)

    w3b = w3.astype(jnp.bfloat16)
    wdb = wd.astype(jnp.bfloat16)
    s3v = s3.reshape(1, Cout).astype(jnp.float32)
    b3v = b3.reshape(1, Cout).astype(jnp.float32)
    sdv = sd.reshape(1, Cout).astype(jnp.float32)
    bdv = bd.reshape(1, Cout).astype(jnp.float32)

    h_spec = pl.BlockSpec((tile_m, width), lambda i: (i, 0))
    x_spec = pl.BlockSpec((tile_m, Cin), lambda i: (i, 0))
    w3_spec = pl.BlockSpec((width, Cout), lambda i: (0, 0))
    wd_spec = pl.BlockSpec((Cin, Cout), lambda i: (0, 0))
    v_spec = pl.BlockSpec((1, Cout), lambda i: (0, 0))
    o_spec = pl.BlockSpec((tile_m, Cout), lambda i: (i, 0))

    return pl.pallas_call(
        _pw_conv_bn_ds_add_relu_kernel,
        out_shape=jax.ShapeDtypeStruct((M, Cout), out_dtype),
        grid_spec=pltpu.PrefetchScalarGridSpec(
            num_scalar_prefetch=0, grid=grid,
            in_specs=[h_spec, x_spec, w3_spec, v_spec, v_spec,
                      wd_spec, v_spec, v_spec],
            out_specs=o_spec),
        compiler_params=pltpu.CompilerParams(
            dimension_semantics=("parallel",),
            vmem_limit_bytes=vmem_limit),
    )(h2d, x2d, w3b, s3v, b3v, wdb, sdv, bdv)


def _conv3x3(x_nhwc, w, scale, bias, *, out_dtype=None, vmem_limit=None):
    """3x3 conv (stride 1, pad 1) + BN + ReLU; grid over (batch, row tiles).

    Halo handling is fully in-kernel (VMEM scratch slab), no host-side pad.
    """
    N, H, W, Cin = x_nhwc.shape
    Cout = w.shape[-1]
    out_dtype = out_dtype or x_nhwc.dtype

    TH = _pick_row_tile(H)
    RT = H // TH

    xb = x_nhwc.astype(jnp.bfloat16)                 # no-op if already bf16
    wb = w.reshape(3, 3 * Cin, Cout).astype(jnp.bfloat16)   # kx folded into K
    s2 = scale.reshape(1, Cout).astype(jnp.float32)
    b2 = bias.reshape(1, Cout).astype(jnp.float32)

    kern = functools.partial(_conv3x3_bn_relu_kernel,
                             TH=TH, W=W, Cin=Cin, Cout=Cout)
    return pl.pallas_call(
        kern,
        out_shape=jax.ShapeDtypeStruct((N, H, W, Cout), out_dtype),
        grid_spec=pltpu.PrefetchScalarGridSpec(
            num_scalar_prefetch=0, grid=(N, RT),
            in_specs=[
                pl.BlockSpec((1, H, W, Cin), lambda n, r: (n, 0, 0, 0)),
                pl.BlockSpec((3, 3 * Cin, Cout), lambda n, r: (0, 0, 0)),
                pl.BlockSpec((1, Cout), lambda n, r: (0, 0)),
                pl.BlockSpec((1, Cout), lambda n, r: (0, 0)),
            ],
            out_specs=pl.BlockSpec((1, TH, W, Cout), lambda n, r: (n, r, 0, 0)),
            scratch_shapes=[pltpu.VMEM((TH + 2, W + 2, Cin), jnp.bfloat16)]),
        compiler_params=pltpu.CompilerParams(
            dimension_semantics=("parallel", "parallel"),
            vmem_limit_bytes=vmem_limit),
    )(xb, wb, s2, b2)


# ---------------------------------------------------------------------------
# Parameters
# ---------------------------------------------------------------------------
def _bn_fold(gamma, beta, mean, var):
    scale = gamma / jnp.sqrt(var + BN_EPS)
    bias = beta - mean * scale
    return scale, bias


def init_bottleneck_params(key, in_planes, planes, *, stride=1, groups=1,
                           base_width=64):
    width = int(planes * (base_width / 64.0)) * groups
    out_ch = 4 * planes
    ks = list(jax.random.split(key, 16))

    def conv_w(k, kh, kw, cin, cout):
        fan_in = cin * kh * kw
        return (jax.random.normal(k, (kh, kw, cin, cout), jnp.float32)
                / jnp.sqrt(float(fan_in)))

    def bn_params(k, c):
        k1, k2, k3, k4 = jax.random.split(k, 4)
        gamma = 1.0 + 0.1 * jax.random.normal(k1, (c,), jnp.float32)
        beta = 0.1 * jax.random.normal(k2, (c,), jnp.float32)
        mean = 0.1 * jax.random.normal(k3, (c,), jnp.float32)
        var = 0.5 + jnp.abs(jax.random.normal(k4, (c,), jnp.float32))
        return _bn_fold(gamma, beta, mean, var)

    p = {}
    p["w1"] = conv_w(ks[0], 1, 1, in_planes, width).reshape(in_planes, width)
    p["s1"], p["b1"] = bn_params(ks[1], width)
    p["w2"] = conv_w(ks[2], 3, 3, width, width)
    p["s2"], p["b2"] = bn_params(ks[3], width)
    p["w3"] = conv_w(ks[4], 1, 1, width, out_ch).reshape(width, out_ch)
    p["s3"], p["b3"] = bn_params(ks[5], out_ch)
    if stride != 1 or in_planes != out_ch:
        p["wd"] = conv_w(ks[6], 1, 1, in_planes, out_ch).reshape(in_planes, out_ch)
        p["sd"], p["bd"] = bn_params(ks[7], out_ch)
    return p


# ---------------------------------------------------------------------------
# Forward (Pallas) and pure-JAX reference
# ---------------------------------------------------------------------------
def bottleneck_forward(x_nchw, params, *, stride=1, groups=1, out_dtype=None):
    assert groups == 1, "TODO(synk): grouped conv not implemented"
    x = jnp.transpose(x_nchw, (0, 2, 3, 1))  # NHWC
    N, H, W, Cin = x.shape
    width = params["w1"].shape[1]
    out_ch = params["w3"].shape[1]
    out_dtype = out_dtype or x.dtype
    tile_m, vmem_limit = _tpu_budget()

    # conv1 (1x1) + bn1 + relu  -> bf16 intermediate (halves HBM bytes).
    h = _pointwise(x.reshape(N * H * W, Cin), params["w1"],
                   params["s1"], params["b1"], relu=True,
                   out_dtype=jnp.bfloat16, tile_m=tile_m,
                   vmem_limit=vmem_limit)
    h = h.reshape(N, H, W, width)

    # conv2 (3x3, pad=1) + bn2 + relu, row-tiled, in-kernel halo.
    h = _conv3x3(h, params["w2"], params["s2"], params["b2"],
                 out_dtype=jnp.bfloat16, vmem_limit=vmem_limit)
    if stride > 1:
        # TODO(synk): accumulate only strided rows/cols in-kernel instead.
        h = h[:, ::stride, ::stride, :]
    Ho, Wo = h.shape[1], h.shape[2]
    h2d = h.reshape(N * Ho * Wo, width)

    # conv3 (1x1) + bn3 + (downsample 1x1+bn fused) + residual add + relu.
    if "wd" in params:
        # 1x1 conv commutes with spatial subsampling: subsample x first.
        xs = x[:, ::stride, ::stride, :] if stride > 1 else x
        y = _tail_fused_downsample(
            h2d, xs.reshape(N * Ho * Wo, Cin),
            params["w3"], params["s3"], params["b3"],
            params["wd"], params["sd"], params["bd"],
            out_dtype=out_dtype, tile_m=tile_m, vmem_limit=vmem_limit)
    else:
        y = _tail_add(h2d, params["w3"], params["s3"], params["b3"],
                      x.reshape(N * Ho * Wo, out_ch),
                      out_dtype=out_dtype, tile_m=tile_m,
                      vmem_limit=vmem_limit)
    y = y.reshape(N, Ho, Wo, out_ch)
    return jnp.transpose(y, (0, 3, 1, 2))  # back to NCHW


def reference_forward(x_nchw, params, *, stride=1):
    x = jnp.transpose(x_nchw, (0, 2, 3, 1))

    def conv(a, w, strides, padding):
        return lax.conv_general_dilated(
            a, w, strides, padding,
            dimension_numbers=("NHWC", "HWIO", "NHWC"),
            precision=lax.Precision.HIGHEST)

    def bn(a, s, b):
        return a * s + b

    w1 = params["w1"].reshape(1, 1, *params["w1"].shape)
    w3 = params["w3"].reshape(1, 1, *params["w3"].shape)

    out = jnp.maximum(bn(conv(x, w1, (1, 1), "VALID"),
                         params["s1"], params["b1"]), 0.0)
    out = jnp.maximum(bn(conv(out, params["w2"], (stride, stride),
                              ((1, 1), (1, 1))),
                         params["s2"], params["b2"]), 0.0)
    out = bn(conv(out, w3, (1, 1), "VALID"), params["s3"], params["b3"])
    if "wd" in params:
        wd = params["wd"].reshape(1, 1, *params["wd"].shape)
        idn = bn(conv(x, wd, (stride, stride), "VALID"),
                 params["sd"], params["bd"])
    else:
        idn = x
    out = jnp.maximum(out + idn, 0.0)
    return jnp.transpose(out, (0, 3, 1, 2))


# ---------------------------------------------------------------------------
if __name__ == "__main__":
    key = jax.random.PRNGKey(0)
    kx, kp, kp2, kx3, kp3 = jax.random.split(key, 5)

    # Small Bottleneck: in_planes=16, planes=8 -> width=8, out=32 (downsample).
    in_planes, planes = 16, 8
    x = jax.random.normal(kx, (2, in_planes, 16, 16), jnp.float32)  # NCHW

    # stride = 1, projection downsample (fused into the tail kernel).
    params = init_bottleneck_params(kp, in_planes, planes, stride=1)
    y = jax.block_until_ready(bottleneck_forward(x, params, stride=1))
    y_ref = reference_forward(x, params, stride=1)
    assert y.shape == (2, 4 * planes, 16, 16), y.shape
    # bf16 matmul inputs (f32 accumulation) -> slightly looser tolerance.
    assert jnp.allclose(y, y_ref, rtol=2e-2, atol=2e-2), float(
        jnp.max(jnp.abs(y - y_ref)))

    # stride = 2 (exercises strided conv2 + pre-subsampled fused downsample).
    params2 = init_bottleneck_params(kp2, in_planes, planes, stride=2)
    y2 = jax.block_until_ready(bottleneck_forward(x, params2, stride=2))
    y2_ref = reference_forward(x, params2, stride=2)
    assert y2.shape == (2, 4 * planes, 8, 8), y2.shape
    assert jnp.allclose(y2, y2_ref, rtol=2e-2, atol=2e-2), float(
        jnp.max(jnp.abs(y2 - y2_ref)))

    # identity path (in_planes == 4*planes): no downsample, residual add kernel.
    x3 = jax.random.normal(kx3, (2, 4 * planes, 16, 16), jnp.float32)
    params3 = init_bottleneck_params(kp3, 4 * planes, planes, stride=1)
    assert "wd" not in params3
    y3 = jax.block_until_ready(bottleneck_forward(x3, params3, stride=1))
    y3_ref = reference_forward(x3, params3, stride=1)
    assert y3.shape == (2, 4 * planes, 16, 16), y3.shape
    assert jnp.allclose(y3, y3_ref, rtol=2e-2, atol=2e-2), float(
        jnp.max(jnp.abs(y3 - y3_ref)))

    print("KERNEL_OK")
</pallas_src>

<mosaic_0001>
module attributes {stable_mosaic.version = 11 : i64} {
  func.func @_pw_conv_bn_kernel(%arg0: i32, %arg1: memref<512x16xf32, #tpu.memory_space<vmem>>, %arg2: memref<16x8xbf16, #tpu.memory_space<vmem>>, %arg3: memref<1x8xf32, #tpu.memory_space<vmem>>, %arg4: memref<1x8xf32, #tpu.memory_space<vmem>>, %arg5: memref<512x8xbf16, #tpu.memory_space<vmem>>) attributes {dimension_semantics = [#tpu.dimension_semantics<parallel>], iteration_bounds = array<i64: 1>, scalar_prefetch = 0 : i64, scratch_operands = 0 : i64, tpu.core_type = #tpu.core_type<tc>, window_params = [{transform_indices = @transform_0, window_bounds = array<i64: 512, 16>}, {pipeline_mode = #tpu.pipeline_mode<synchronous>, transform_indices = @transform_1, window_bounds = array<i64: 16, 8>}, {pipeline_mode = #tpu.pipeline_mode<synchronous>, transform_indices = @transform_2, window_bounds = array<i64: 1, 8>}, {pipeline_mode = #tpu.pipeline_mode<synchronous>, transform_indices = @transform_3, window_bounds = array<i64: 1, 8>}, {transform_indices = @transform_4, window_bounds = array<i64: 512, 8>}]} {
    %c0 = arith.constant 0 : index
    %c0_0 = arith.constant 0 : index
    %0 = vector.load %arg1[%c0, %c0_0] : memref<512x16xf32, #tpu.memory_space<vmem>>, vector<512x16xf32>
    %1 = arith.truncf %0 : vector<512x16xf32> to vector<512x16xbf16>
    %c0_1 = arith.constant 0 : index
    %c0_2 = arith.constant 0 : index
    %2 = vector.load %arg2[%c0_1, %c0_2] : memref<16x8xbf16, #tpu.memory_space<vmem>>, vector<16x8xbf16>
    %cst = arith.constant dense<0.000000e+00> : vector<512x8xf32>
    %3 = tpu.matmul %1, %2, %cst {dimension_numbers = #tpu.dot_dimension_numbers<[1], [0], [0], [1], [0, 0, 1, 1], [], []>} : vector<512x16xbf16>, vector<16x8xbf16>, vector<512x8xf32> -> vector<512x8xf32>
    %c0_3 = arith.constant 0 : index
    %c0_4 = arith.constant 0 : index
    %4 = vector.load %arg3[%c0_3, %c0_4] : memref<1x8xf32, #tpu.memory_space<vmem>>, vector<1x8xf32>
    %5 = vector.broadcast %4 : vector<1x8xf32> to vector<512x8xf32>
    %6 = arith.mulf %3, %5 : vector<512x8xf32>
    %c0_5 = arith.constant 0 : index
    %c0_6 = arith.constant 0 : index
    %7 = vector.load %arg4[%c0_5, %c0_6] : memref<1x8xf32, #tpu.memory_space<vmem>>, vector<1x8xf32>
    %8 = vector.broadcast %7 : vector<1x8xf32> to vector<512x8xf32>
    %9 = arith.addf %6, %8 : vector<512x8xf32>
    %cst_7 = arith.constant 0.000000e+00 : f32
    %10 = vector.broadcast %cst_7 : f32 to vector<512x8xf32>
    %11 = arith.maximumf %9, %10 : vector<512x8xf32>
    %12 = arith.truncf %11 : vector<512x8xf32> to vector<512x8xbf16>
    %c0_8 = arith.constant 0 : index
    %c0_9 = arith.constant 0 : index
    %13 = vector.load %arg5[%c0_8, %c0_9] : memref<512x8xbf16, #tpu.memory_space<vmem>>, vector<512x8xbf16>
    tpu.vector_store %arg5[%c0_8, %c0_9], %12 {strides = array<i32>} : memref<512x8xbf16, #tpu.memory_space<vmem>>, vector<512x8xbf16>,
    return
  }
  func.func @transform_0(%arg0: i32) -> (i32, i32) {
    %c0_i32 = arith.constant 0 : i32
    %c0_i32_0 = arith.constant 0 : i32
    return %arg0, %c0_i32 : i32, i32
  }
  func.func @transform_1(%arg0: i32) -> (i32, i32) {
    %c0_i32 = arith.constant 0 : i32
    %c0_i32_0 = arith.constant 0 : i32
    %c0_i32_1 = arith.constant 0 : i32
    return %c0_i32, %c0_i32_0 : i32, i32
  }
  func.func @transform_2(%arg0: i32) -> (i32, i32) {
    %c0_i32 = arith.constant 0 : i32
    %c0_i32_0 = arith.constant 0 : i32
    %c0_i32_1 = arith.constant 0 : i32
    return %c0_i32, %c0_i32_0 : i32, i32
  }
  func.func @transform_3(%arg0: i32) -> (i32, i32) {
    %c0_i32 = arith.constant 0 : i32
    %c0_i32_0 = arith.constant 0 : i32
    %c0_i32_1 = arith.constant 0 : i32
    return %c0_i32, %c0_i32_0 : i32, i32
  }
  func.func @transform_4(%arg0: i32) -> (i32, i32) {
    %c0_i32 = arith.constant 0 : i32
    %c0_i32_0 = arith.constant 0 : i32
    return %arg0, %c0_i32 : i32, i32
  }
}

</mosaic_0001>

<bundles_post_ra>
// kernel: tpu_custom_call.1
= control target key start
LH: loop header
LB: loop body
LE: loop exit
PB: predicated region body
PF: predicated region fallthrough
CT: control target
= control target key end

     0   :  { %vm122_vm0 = vcmask 130048   ;;  %vm652_vm1 = vcmask 60416   ;;  %s1409_s1 = inlined_call_operand.vmem [shape: bf16[16,8], index: 1, kind: input, shape index: {}]   ;;  %s1410_s0 = inlined_call_operand.vmem [shape: f32[512,16], index: 0, kind: input, shape index: {}]   ;;  %s1411_s2 = inlined_call_operand.vmem [shape: f32[1,8], index: 2, kind: input, shape index: {}]   ;;  %s1412_s3 = inlined_call_operand.vmem [shape: f32[1,8], index: 3, kind: input, shape index: {}]   ;;  %s1413_s4 = inlined_call_operand.vmem [shape: bf16[512,8], index: 4, kind: output, shape index: {}]  }
   0x1   :  { %v757_v0 = vld [vmem:[%s1409_s1] sm:$0xff]  ;;  %v19_v2 = vld [vmem:[%s1410_s0 + $0x8] sm:$0xff]  ;;  %v20_v13 = vld [vmem:[%s1410_s0 + $0x10] sm:$0xff] }
   0x2   :  { %v18_v1 = vld [vmem:[%s1410_s0] sm:$0xff]  ;;  %v35_v5 = vld [vmem:[%s1410_s0 + $0x88] sm:$0xff]  ;;  %226 = vmatpush.bf16.msra.mxu0 %v757_v0  ;;  %758 = vmatpush.bf16.msra.mxu1 %v757_v0  ;;  %v21_v14 = vld [vmem:[%s1410_s0 + $0x18] sm:$0xff] }
   0x3   :  { %v82_v3 = vpack.c.bf16 %v19_v2, %v18_v1  ;;  %v34_v4 = vld [vmem:[%s1410_s0 + $0x80] sm:$0xff]  ;;  %v51_v8 = vld [vmem:[%s1410_s0 + $0x108] sm:$0xff]  ;;  %759 = vmatpush.bf16.msra.mxu2 %v757_v0  ;;  %760 = vmatpush.bf16.msra.mxu3 %v757_v0  ;;  %v36_v15 = vld [vmem:[%s1410_s0 + $0x90] sm:$0xff]  ;;  %v83_v21 = vpack.c.bf16 %v21_v14, %v20_v13 }
   0x4   :  { %v50_v6 = vld [vmem:[%s1410_s0 + $0x100] sm:$0xff]  ;;  %v90_v7 = vpack.c.bf16 %v35_v5, %v34_v4  ;;  %v67_v10 = vld [vmem:[%s1410_s0 + $0x188] sm:$0xff]  ;;  %v37_v16 = vld [vmem:[%s1410_s0 + $0x98] sm:$0xff] }
   0x5   :  { %v66_v9 = vld [vmem:[%s1410_s0 + $0x180] sm:$0xff]  ;;  %v98_v11 = vpack.c.bf16 %v51_v8, %v50_v6  ;;  %725 = vmatmul.msk.bf16.vlgmr.msra.gmra.mxu0 %vm122_vm0, %v82_v3  ;;  %v52_v17 = vld [vmem:[%s1410_s0 + $0x110] sm:$0xff]  ;;  %v53_v18 = vld [vmem:[%s1410_s0 + $0x118] sm:$0xff]  ;;  %v91_v22 = vpack.c.bf16 %v37_v16, %v36_v15 }
   0x6   :  { %v106_v12 = vpack.c.bf16 %v67_v10, %v66_v9  ;;  %733 = vmatmul.msk.bf16.vlgmr.msra.gmra.mxu1 %vm122_vm0, %v90_v7  ;;  %v68_v19 = vld [vmem:[%s1410_s0 + $0x190] sm:$0xff]  ;;  %v69_v20 = vld [vmem:[%s1410_s0 + $0x198] sm:$0xff]  ;;  %v99_v23 = vpack.c.bf16 %v53_v18, %v52_v17  ;;  %v22_v25 = vld [vmem:[%s1410_s0 + $0x20] sm:$0xff] }
   0x7   :  { %741 = vmatmul.msk.bf16.vlgmr.msra.gmra.mxu2 %vm122_vm0, %v98_v11  ;;  %v107_v24 = vpack.c.bf16 %v69_v20, %v68_v19  ;;  %v23_v26 = vld [vmem:[%s1410_s0 + $0x28] sm:$0xff]  ;;  %v38_v27 = vld [vmem:[%s1410_s0 + $0xa0] sm:$0xff]  ;;  %v24_v37 = vld [vmem:[%s1410_s0 + $0x30] sm:$0xff] }
   0x8   :  { %749 = vmatmul.msk.bf16.vlgmr.msra.gmra.mxu3 %vm122_vm0, %v106_v12  ;;  %v39_v28 = vld [vmem:[%s1410_s0 + $0xa8] sm:$0xff]  ;;  %v54_v29 = vld [vmem:[%s1410_s0 + $0x120] sm:$0xff]  ;;  %v84_v33 = vpack.c.bf16 %v23_v26, %v22_v25  ;;  %v25_v38 = vld [vmem:[%s1410_s0 + $0x38] sm:$0xff] }
   0x9   :  { %v55_v30 = vld [vmem:[%s1410_s0 + $0x128] sm:$0xff]  ;;  %v70_v31 = vld [vmem:[%s1410_s0 + $0x1a0] sm:$0xff]  ;;  %v92_v34 = vpack.c.bf16 %v39_v28, %v38_v27  ;;  %v40_v39 = vld [vmem:[%s1410_s0 + $0xb0] sm:$0xff]  ;;  %v85_v45 = vpack.c.bf16 %v25_v38, %v24_v37 }
   0xa   :  { %v71_v32 = vld [vmem:[%s1410_s0 + $0x1a8] sm:$0xff]  ;;  %v100_v35 = vpack.c.bf16 %v55_v30, %v54_v29  ;;  %v41_v40 = vld [vmem:[%s1410_s0 + $0xb8] sm:$0xff]  ;;  %v56_v41 = vld [vmem:[%s1410_s0 + $0x130] sm:$0xff] }
   0xb   :  { %v108_v36 = vpack.c.bf16 %v71_v32, %v70_v31  ;;  %v57_v42 = vld [vmem:[%s1410_s0 + $0x138] sm:$0xff]  ;;  %v72_v43 = vld [vmem:[%s1410_s0 + $0x1b0] sm:$0xff]  ;;  %v93_v46 = vpack.c.bf16 %v41_v40, %v40_v39  ;;  %v26_v49 = vld [vmem:[%s1410_s0 + $0x40] sm:$0xff] }
   0xc   :  { %v73_v44 = vld [vmem:[%s1410_s0 + $0x1b8] sm:$0xff]  ;;  %v101_v47 = vpack.c.bf16 %v57_v42, %v56_v41  ;;  %v27_v50 = vld [vmem:[%s1410_s0 + $0x48] sm:$0xff]  ;;  %v42_v51 = vld [vmem:[%s1410_s0 + $0xc0] sm:$0xff] }
   0xd   :  { %v109_v48 = vpack.c.bf16 %v73_v44, %v72_v43  ;;  %v43_v52 = vld [vmem:[%s1410_s0 + $0xc8] sm:$0xff]  ;;  %v58_v53 = vld [vmem:[%s1410_s0 + $0x140] sm:$0xff]  ;;  %v86_v57 = vpack.c.bf16 %v27_v50, %v26_v49  ;;  %v28_v61 = vld [vmem:[%s1410_s0 + $0x50] sm:$0xff] }
   0xe   :  { %v59_v54 = vld [vmem:[%s1410_s0 + $0x148] sm:$0xff]  ;;  %v74_v55 = vld [vmem:[%s1410_s0 + $0x1c0] sm:$0xff]  ;;  %v94_v58 = vpack.c.bf16 %v43_v52, %v42_v51  ;;  %v29_v62 = vld [vmem:[%s1410_s0 + $0x58] sm:$0xff] }
   0xf   :  { %v75_v56 = vld [vmem:[%s1410_s0 + $0x1c8] sm:$0xff]  ;;  %v102_v59 = vpack.c.bf16 %v59_v54, %v58_v53  ;;  %v44_v63 = vld [vmem:[%s1410_s0 + $0xd0] sm:$0xff]  ;;  %v45_v0 = vld [vmem:[%s1410_s0 + $0xd8] sm:$0xff]  ;;  %v87_v5 = vpack.c.bf16 %v29_v62, %v28_v61 }
  0x10   :  { %v110_v60 = vpack.c.bf16 %v75_v56, %v74_v55  ;;  %v60_v1 = vld [vmem:[%s1410_s0 + $0x150] sm:$0xff]  ;;  %v61_v2 = vld [vmem:[%s1410_s0 + $0x158] sm:$0xff]  ;;  %v95_v6 = vpack.c.bf16 %v45_v0, %v44_v63  ;;  %v30_v9 = vld [vmem:[%s1410_s0 + $0x60] sm:$0xff] }
  0x11   :  { %v76_v3 = vld [vmem:[%s1410_s0 + $0x1d0] sm:$0xff]  ;;  %v77_v4 = vld [vmem:[%s1410_s0 + $0x1d8] sm:$0xff]  ;;  %v103_v7 = vpack.c.bf16 %v61_v2, %v60_v1  ;;  %v31_v10 = vld [vmem:[%s1410_s0 + $0x68] sm:$0xff] }
  0x12   :  { %v111_v8 = vpack.c.bf16 %v77_v4, %v76_v3  ;;  %v46_v11 = vld [vmem:[%s1410_s0 + $0xe0] sm:$0xff]  ;;  %v47_v12 = vld [vmem:[%s1410_s0 + $0xe8] sm:$0xff]  ;;  %v88_v17 = vpack.c.bf16 %v31_v10, %v30_v9  ;;  %v64_v25 = vld [vmem:[%s1410_s0 + $0x170] sm:$0xff] }
  0x13   :  { %v62_v13 = vld [vmem:[%s1410_s0 + $0x160] sm:$0xff]  ;;  %v63_v14 = vld [vmem:[%s1410_s0 + $0x168] sm:$0xff]  ;;  %v96_v18 = vpack.c.bf16 %v47_v12, %v46_v11  ;;  %v65_v26 = vld [vmem:[%s1410_s0 + $0x178] sm:$0xff] }
  0x14   :  { %v78_v15 = vld [vmem:[%s1410_s0 + $0x1e0] sm:$0xff]  ;;  %v79_v16 = vld [vmem:[%s1410_s0 + $0x1e8] sm:$0xff]  ;;  %v104_v19 = vpack.c.bf16 %v63_v14, %v62_v13  ;;  %v80_v27 = vld [vmem:[%s1410_s0 + $0x1f0] sm:$0xff]  ;;  %v105_v31 = vpack.c.bf16 %v65_v26, %v64_v25 }
  0x15   :  { %726 = vmatmul.msk.bf16.gmra.mxu0 %vm122_vm0, %v83_v21  ;;  %v112_v20 = vpack.c.bf16 %v79_v16, %v78_v15  ;;  %v32_v21 = vld [vmem:[%s1410_s0 + $0x70] sm:$0xff]  ;;  %v81_v28 = vld [vmem:[%s1410_s0 + $0x1f8] sm:$0xff] }
  0x16   :  { %734 = vmatmul.msk.bf16.gmra.mxu1 %vm122_vm0, %v91_v22  ;;  %v33_v22 = vld [vmem:[%s1410_s0 + $0x78] sm:$0xff]  ;;  %v113_v32 = vpack.c.bf16 %v81_v28, %v80_v27 }
  0x17   :  { %742 = vmatmul.msk.bf16.gmra.mxu2 %vm122_vm0, %v99_v23  ;;  %v48_v23 = vld [vmem:[%s1410_s0 + $0xf0] sm:$0xff]  ;;  %v89_v29 = vpack.c.bf16 %v33_v22, %v32_v21 }
  0x18   :  { %750 = vmatmul.msk.bf16.gmra.mxu3 %vm122_vm0, %v107_v24  ;;  %v49_v24 = vld [vmem:[%s1410_s0 + $0xf8] sm:$0xff] }
  0x19   :  { %v97_v30 = vpack.c.bf16 %v49_v24, %v48_v23 }
  0x25   :  { %727 = vmatmul.msk.bf16.gmra.mxu0 %vm122_vm0, %v84_v33  ;;  %v1018_v33 = vld [vmem:[%s1411_s2] ss:$0 sm:$0xff] }
  0x26   :  { %735 = vmatmul.msk.bf16.gmra.mxu1 %vm122_vm0, %v92_v34  ;;  %v1023_v34 = vld [vmem:[%s1412_s3] ss:$0 sm:$0xff] }
  0x27   :  { %743 = vmatmul.msk.bf16.gmra.mxu2 %vm122_vm0, %v100_v35 }
  0x28   :  { %751 = vmatmul.msk.bf16.gmra.mxu3 %vm122_vm0, %v108_v36 }
  0x35   :  { %728 = vmatmul.msk.bf16.gmra.mxu0 %vm122_vm0, %v85_v45 }
  0x36   :  { %736 = vmatmul.msk.bf16.gmra.mxu1 %vm122_vm0, %v93_v46 }
  0x37   :  { %744 = vmatmul.msk.bf16.gmra.mxu2 %vm122_vm0, %v101_v47 }
  0x38   :  { %752 = vmatmul.msk.bf16.gmra.mxu3 %vm122_vm0, %v109_v48 }
  0x45   :  { %729 = vmatmul.msk.bf16.gmra.mxu0 %vm122_vm0, %v86_v57 }
  0x46   :  { %737 = vmatmul.msk.bf16.gmra.mxu1 %vm122_vm0, %v94_v58 }
  0x47   :  { %745 = vmatmul.msk.bf16.gmra.mxu2 %vm122_vm0, %v102_v59 }
  0x48   :  { %753 = vmatmul.msk.bf16.gmra.mxu3 %vm122_vm0, %v110_v60 }
  0x55   :  { %730 = vmatmul.msk.bf16.gmra.mxu0 %vm122_vm0, %v87_v5 }
  0x56   :  { %738 = vmatmul.msk.bf16.gmra.mxu1 %vm122_vm0, %v95_v6 }
  0x57   :  { %746 = vmatmul.msk.bf16.gmra.mxu2 %vm122_vm0, %v103_v7 }
  0x58   :  { %754 = vmatmul.msk.bf16.gmra.mxu3 %vm122_vm0, %v111_v8 }
  0x65   :  { %731 = vmatmul.msk.bf16.gmra.mxu0 %vm122_vm0, %v88_v17 }
  0x66   :  { %739 = vmatmul.msk.bf16.gmra.mxu1 %vm122_vm0, %v96_v18 }
  0x67   :  { %747 = vmatmul.msk.bf16.gmra.mxu2 %vm122_vm0, %v104_v19 }
  0x68   :  { %755 = vmatmul.msk.bf16.gmra.mxu3 %vm122_vm0, %v112_v20 }
  0x75   :  { %732 = vmatmul.msk.bf16.gmra.mxu0 %vm122_vm0, %v89_v29 }
  0x76   :  { %740 = vmatmul.msk.bf16.gmra.mxu1 %vm122_vm0, %v97_v30 }
  0x77   :  { %748 = vmatmul.msk.bf16.gmra.mxu2 %vm122_vm0, %v105_v31 }
  0x78   :  { %756 = vmatmul.msk.bf16.gmra.mxu3 %vm122_vm0, %v113_v32 }
  0x82   :  { %v228_v35 = vpop.f32.mrf.mxu0 }
  0x83   :  { %v268_v36 = vpop.f32.mrf.mxu1  ;;  %v392_v37 = vmul.f32 %v1018_v33, %v228_v35 }
  0x84   :  { %v408_v38 = vmul.f32 %v1018_v33, %v268_v36 }
  0x85   :  { %v460_v39 = vadd.f32 %v1023_v34, %v392_v37 }
  0x86   :  { %v476_v40 = vadd.f32 %v1023_v34, %v408_v38 }
  0x87   :  { %v524_v41 = vmax.f32 %v460_v39, 0.0 }
  0x88   :  { %v540_v42 = vmax.f32 %v476_v40, 0.0 }
  0x89   :  { %v588_v43 = vpack.c.bf16 %v524_v41, %v524_v41 }
  0x8a   :  { %v604_v44 = vpack.c.bf16 %v540_v42, %v540_v42  ;;  %v308_v45 = vpop.f32.mrf.mxu2  ;;  %v230_v49 = vpop.f32.mrf.mxu0 }
  0x8b   :  { %v348_v46 = vpop.f32.mrf.mxu3  ;;  %v424_v47 = vmul.f32 %v1018_v33, %v308_v45  ;;  %v270_v50 = vpop.f32.mrf.mxu1  ;;  %653 = vst.msk [vmem:[%s1413_s4] sm:$0xf] %vm652_vm1, %v588_v43  ;;  %v393_v51 = vmul.f32 %v1018_v33, %v230_v49 }
  0x8c   :  { %v440_v48 = vmul.f32 %v1018_v33, %v348_v46  ;;  %v409_v52 = vmul.f32 %v1018_v33, %v270_v50  ;;  %669 = vst.msk [vmem:[%s1413_s4 + $0x40] sm:$0xf] %vm652_vm1, %v604_v44 }
  0x8d   :  { %v492_v53 = vadd.f32 %v1023_v34, %v424_v47  ;;  %v461_v55 = vadd.f32 %v1023_v34, %v393_v51 }
  0x8e   :  { %v508_v54 = vadd.f32 %v1023_v34, %v440_v48  ;;  %v477_v56 = vadd.f32 %v1023_v34, %v409_v52 }
  0x8f   :  { %v556_v57 = vmax.f32 %v492_v53, 0.0  ;;  %v525_v59 = vmax.f32 %v461_v55, 0.0 }
  0x90   :  { %v572_v58 = vmax.f32 %v508_v54, 0.0  ;;  %v541_v60 = vmax.f32 %v477_v56, 0.0 }
  0x91   :  { %v620_v61 = vpack.c.bf16 %v556_v57, %v556_v57  ;;  %v589_v63 = vpack.c.bf16 %v525_v59, %v525_v59 }
  0x92   :  { %v636_v62 = vpack.c.bf16 %v572_v58, %v572_v58  ;;  %v605_v0 = vpack.c.bf16 %v541_v60, %v541_v60  ;;  %v310_v1 = vpop.f32.mrf.mxu2  ;;  %v233_v5 = vpop.f32.mrf.mxu0 }
  0x93   :  { %v350_v2 = vpop.f32.mrf.mxu3  ;;  %685 = vst.msk [vmem:[%s1413_s4 + $0x80] sm:$0xf] %vm652_vm1, %v620_v61  ;;  %v425_v3 = vmul.f32 %v1018_v33, %v310_v1  ;;  %v273_v6 = vpop.f32.mrf.mxu1  ;;  %v394_v7 = vmul.f32 %v1018_v33, %v233_v5 }
  0x94   :  { %v441_v4 = vmul.f32 %v1018_v33, %v350_v2  ;;  %701 = vst.msk [vmem:[%s1413_s4 + $0xc0] sm:$0xf] %vm652_vm1, %v636_v62  ;;  %v410_v8 = vmul.f32 %v1018_v33, %v273_v6 }
  0x95   :  { %654 = vst.msk [vmem:[%s1413_s4 + $0x4] sm:$0xf] %vm652_vm1, %v589_v63  ;;  %v493_v9 = vadd.f32 %v1023_v34, %v425_v3  ;;  %v462_v11 = vadd.f32 %v1023_v34, %v394_v7 }
  0x96   :  { %v509_v10 = vadd.f32 %v1023_v34, %v441_v4  ;;  %670 = vst.msk [vmem:[%s1413_s4 + $0x44] sm:$0xf] %vm652_vm1, %v605_v0  ;;  %v478_v12 = vadd.f32 %v1023_v34, %v410_v8 }
  0x97   :  { %v557_v13 = vmax.f32 %v493_v9, 0.0  ;;  %v526_v15 = vmax.f32 %v462_v11, 0.0 }
  0x98   :  { %v573_v14 = vmax.f32 %v509_v10, 0.0  ;;  %v542_v16 = vmax.f32 %v478_v12, 0.0 }
  0x99   :  { %v621_v17 = vpack.c.bf16 %v557_v13, %v557_v13  ;;  %v590_v19 = vpack.c.bf16 %v526_v15, %v526_v15 }
  0x9a   :  { %v637_v18 = vpack.c.bf16 %v573_v14, %v573_v14  ;;  %v606_v20 = vpack.c.bf16 %v542_v16, %v542_v16  ;;  %v313_v21 = vpop.f32.mrf.mxu2  ;;  %v235_v25 = vpop.f32.mrf.mxu0 }
  0x9b   :  { %v353_v22 = vpop.f32.mrf.mxu3  ;;  %686 = vst.msk [vmem:[%s1413_s4 + $0x84] sm:$0xf] %vm652_vm1, %v621_v17  ;;  %v426_v23 = vmul.f32 %v1018_v33, %v313_v21  ;;  %v275_v26 = vpop.f32.mrf.mxu1  ;;  %v395_v27 = vmul.f32 %v1018_v33, %v235_v25 }
  0x9c   :  { %v442_v24 = vmul.f32 %v1018_v33, %v353_v22  ;;  %702 = vst.msk [vmem:[%s1413_s4 + $0xc4] sm:$0xf] %vm652_vm1, %v637_v18  ;;  %v411_v28 = vmul.f32 %v1018_v33, %v275_v26 }
  0x9d   :  { %655 = vst.msk [vmem:[%s1413_s4 + $0x8] sm:$0xf] %vm652_vm1, %v590_v19  ;;  %v494_v29 = vadd.f32 %v1023_v34, %v426_v23  ;;  %v463_v31 = vadd.f32 %v1023_v34, %v395_v27 }
  0x9e   :  { %v510_v30 = vadd.f32 %v1023_v34, %v442_v24  ;;  %671 = vst.msk [vmem:[%s1413_s4 + $0x48] sm:$0xf] %vm652_vm1, %v606_v20  ;;  %v479_v32 = vadd.f32 %v1023_v34, %v411_v28 }
  0x9f   :  { %v558_v35 = vmax.f32 %v494_v29, 0.0  ;;  %v527_v37 = vmax.f32 %v463_v31, 0.0 }
  0xa0   :  { %v574_v36 = vmax.f32 %v510_v30, 0.0  ;;  %v543_v38 = vmax.f32 %v479_v32, 0.0 }
  0xa1   :  { %v622_v39 = vpack.c.bf16 %v558_v35, %v558_v35  ;;  %v591_v41 = vpack.c.bf16 %v527_v37, %v527_v37 }
  0xa2   :  { %v638_v40 = vpack.c.bf16 %v574_v36, %v574_v36  ;;  %v607_v42 = vpack.c.bf16 %v543_v38, %v543_v38  ;;  %v315_v43 = vpop.f32.mrf.mxu2  ;;  %v238_v47 = vpop.f32.mrf.mxu0 }
  0xa3   :  { %v355_v44 = vpop.f32.mrf.mxu3  ;;  %687 = vst.msk [vmem:[%s1413_s4 + $0x88] sm:$0xf] %vm652_vm1, %v622_v39  ;;  %v427_v45 = vmul.f32 %v1018_v33, %v315_v43  ;;  %v278_v48 = vpop.f32.mrf.mxu1  ;;  %v396_v49 = vmul.f32 %v1018_v33, %v238_v47 }
  0xa4   :  { %v443_v46 = vmul.f32 %v1018_v33, %v355_v44  ;;  %703 = vst.msk [vmem:[%s1413_s4 + $0xc8] sm:$0xf] %vm652_vm1, %v638_v40  ;;  %v412_v50 = vmul.f32 %v1018_v33, %v278_v48 }
  0xa5   :  { %656 = vst.msk [vmem:[%s1413_s4 + $0xc] sm:$0xf] %vm652_vm1, %v591_v41  ;;  %v495_v51 = vadd.f32 %v1023_v34, %v427_v45  ;;  %v464_v53 = vadd.f32 %v1023_v34, %v396_v49 }
  0xa6   :  { %v511_v52 = vadd.f32 %v1023_v34, %v443_v46  ;;  %672 = vst.msk [vmem:[%s1413_s4 + $0x4c] sm:$0xf] %vm652_vm1, %v607_v42  ;;  %v480_v54 = vadd.f32 %v1023_v34, %v412_v50 }
  0xa7   :  { %v559_v55 = vmax.f32 %v495_v51, 0.0  ;;  %v528_v57 = vmax.f32 %v464_v53, 0.0 }
  0xa8   :  { %v575_v56 = vmax.f32 %v511_v52, 0.0  ;;  %v544_v58 = vmax.f32 %v480_v54, 0.0 }
  0xa9   :  { %v623_v59 = vpack.c.bf16 %v559_v55, %v559_v55  ;;  %v592_v61 = vpack.c.bf16 %v528_v57, %v528_v57 }
  0xaa   :  { %v639_v60 = vpack.c.bf16 %v575_v56, %v575_v56  ;;  %v608_v62 = vpack.c.bf16 %v544_v58, %v544_v58  ;;  %v318_v63 = vpop.f32.mrf.mxu2  ;;  %v240_v3 = vpop.f32.mrf.mxu0 }
  0xab   :  { %v358_v0 = vpop.f32.mrf.mxu3  ;;  %688 = vst.msk [vmem:[%s1413_s4 + $0x8c] sm:$0xf] %vm652_vm1, %v623_v59  ;;  %v428_v1 = vmul.f32 %v1018_v33, %v318_v63  ;;  %v280_v4 = vpop.f32.mrf.mxu1  ;;  %v397_v5 = vmul.f32 %v1018_v33, %v240_v3 }
  0xac   :  { %v444_v2 = vmul.f32 %v1018_v33, %v358_v0  ;;  %704 = vst.msk [vmem:[%s1413_s4 + $0xcc] sm:$0xf] %vm652_vm1, %v639_v60  ;;  %v413_v6 = vmul.f32 %v1018_v33, %v280_v4 }
  0xad   :  { %657 = vst.msk [vmem:[%s1413_s4 + $0x10] sm:$0xf] %vm652_vm1, %v592_v61  ;;  %v496_v7 = vadd.f32 %v1023_v34, %v428_v1  ;;  %v465_v9 = vadd.f32 %v1023_v34, %v397_v5 }
  0xae   :  { %v512_v8 = vadd.f32 %v1023_v34, %v444_v2  ;;  %673 = vst.msk [vmem:[%s1413_s4 + $0x50] sm:$0xf] %vm652_vm1, %v608_v62  ;;  %v481_v10 = vadd.f32 %v1023_v34, %v413_v6 }
  0xaf   :  { %v560_v11 = vmax.f32 %v496_v7, 0.0  ;;  %v529_v13 = vmax.f32 %v465_v9, 0.0 }
  0xb0   :  { %v576_v12 = vmax.f32 %v512_v8, 0.0  ;;  %v545_v14 = vmax.f32 %v481_v10, 0.0 }
  0xb1   :  { %v624_v15 = vpack.c.bf16 %v560_v11, %v560_v11  ;;  %v593_v17 = vpack.c.bf16 %v529_v13, %v529_v13 }
  0xb2   :  { %v640_v16 = vpack.c.bf16 %v576_v12, %v576_v12  ;;  %v609_v18 = vpack.c.bf16 %v545_v14, %v545_v14  ;;  %v320_v19 = vpop.f32.mrf.mxu2  ;;  %v243_v23 = vpop.f32.mrf.mxu0 }
  0xb3   :  { %v360_v20 = vpop.f32.mrf.mxu3  ;;  %689 = vst.msk [vmem:[%s1413_s4 + $0x90] sm:$0xf] %vm652_vm1, %v624_v15  ;;  %v429_v21 = vmul.f32 %v1018_v33, %v320_v19  ;;  %v283_v24 = vpop.f32.mrf.mxu1  ;;  %v398_v25 = vmul.f32 %v1018_v33, %v243_v23 }
  0xb4   :  { %v445_v22 = vmul.f32 %v1018_v33, %v360_v20  ;;  %705 = vst.msk [vmem:[%s1413_s4 + $0xd0] sm:$0xf] %vm652_vm1, %v640_v16  ;;  %v414_v26 = vmul.f32 %v1018_v33, %v283_v24 }
  0xb5   :  { %658 = vst.msk [vmem:[%s1413_s4 + $0x14] sm:$0xf] %vm652_vm1, %v593_v17  ;;  %v497_v27 = vadd.f32 %v1023_v34, %v429_v21  ;;  %v466_v29 = vadd.f32 %v1023_v34, %v398_v25 }
  0xb6   :  { %v513_v28 = vadd.f32 %v1023_v34, %v445_v22  ;;  %674 = vst.msk [vmem:[%s1413_s4 + $0x54] sm:$0xf] %vm652_vm1, %v609_v18  ;;  %v482_v30 = vadd.f32 %v1023_v34, %v414_v26 }
  0xb7   :  { %v561_v31 = vmax.f32 %v497_v27, 0.0  ;;  %v530_v35 = vmax.f32 %v466_v29, 0.0 }
  0xb8   :  { %v577_v32 = vmax.f32 %v513_v28, 0.0  ;;  %v546_v36 = vmax.f32 %v482_v30, 0.0 }
  0xb9   :  { %v625_v37 = vpack.c.bf16 %v561_v31, %v561_v31  ;;  %v594_v39 = vpack.c.bf16 %v530_v35, %v530_v35 }
  0xba   :  { %v641_v38 = vpack.c.bf16 %v577_v32, %v577_v32  ;;  %v610_v40 = vpack.c.bf16 %v546_v36, %v546_v36  ;;  %v323_v41 = vpop.f32.mrf.mxu2  ;;  %v245_v45 = vpop.f32.mrf.mxu0 }
  0xbb   :  { %v363_v42 = vpop.f32.mrf.mxu3  ;;  %690 = vst.msk [vmem:[%s1413_s4 + $0x94] sm:$0xf] %vm652_vm1, %v625_v37  ;;  %v430_v43 = vmul.f32 %v1018_v33, %v323_v41  ;;  %v285_v46 = vpop.f32.mrf.mxu1  ;;  %v399_v47 = vmul.f32 %v1018_v33, %v245_v45 }
  0xbc   :  { %v446_v44 = vmul.f32 %v1018_v33, %v363_v42  ;;  %706 = vst.msk [vmem:[%s1413_s4 + $0xd4] sm:$0xf] %vm652_vm1, %v641_v38  ;;  %v415_v48 = vmul.f32 %v1018_v33, %v285_v46 }
  0xbd   :  { %659 = vst.msk [vmem:[%s1413_s4 + $0x18] sm:$0xf] %vm652_vm1, %v594_v39  ;;  %v498_v49 = vadd.f32 %v1023_v34, %v430_v43  ;;  %v467_v51 = vadd.f32 %v1023_v34, %v399_v47 }
  0xbe   :  { %v514_v50 = vadd.f32 %v1023_v34, %v446_v44  ;;  %675 = vst.msk [vmem:[%s1413_s4 + $0x58] sm:$0xf] %vm652_vm1, %v610_v40  ;;  %v483_v52 = vadd.f32 %v1023_v34, %v415_v48 }
  0xbf   :  { %v562_v53 = vmax.f32 %v498_v49, 0.0  ;;  %v531_v55 = vmax.f32 %v467_v51, 0.0 }
  0xc0   :  { %v578_v54 = vmax.f32 %v514_v50, 0.0  ;;  %v547_v56 = vmax.f32 %v483_v52, 0.0 }
  0xc1   :  { %v626_v57 = vpack.c.bf16 %v562_v53, %v562_v53  ;;  %v595_v59 = vpack.c.bf16 %v531_v55, %v531_v55 }
  0xc2   :  { %v642_v58 = vpack.c.bf16 %v578_v54, %v578_v54  ;;  %v611_v60 = vpack.c.bf16 %v547_v56, %v547_v56  ;;  %v325_v61 = vpop.f32.mrf.mxu2  ;;  %v248_v1 = vpop.f32.mrf.mxu0 }
  0xc3   :  { %v365_v62 = vpop.f32.mrf.mxu3  ;;  %691 = vst.msk [vmem:[%s1413_s4 + $0x98] sm:$0xf] %vm652_vm1, %v626_v57  ;;  %v431_v63 = vmul.f32 %v1018_v33, %v325_v61  ;;  %v288_v2 = vpop.f32.mrf.mxu1  ;;  %v400_v3 = vmul.f32 %v1018_v33, %v248_v1 }
  0xc4   :  { %v447_v0 = vmul.f32 %v1018_v33, %v365_v62  ;;  %707 = vst.msk [vmem:[%s1413_s4 + $0xd8] sm:$0xf] %vm652_vm1, %v642_v58  ;;  %v416_v4 = vmul.f32 %v1018_v33, %v288_v2 }
  0xc5   :  { %660 = vst.msk [vmem:[%s1413_s4 + $0x1c] sm:$0xf] %vm652_vm1, %v595_v59  ;;  %v499_v5 = vadd.f32 %v1023_v34, %v431_v63  ;;  %v468_v7 = vadd.f32 %v1023_v34, %v400_v3 }
  0xc6   :  { %v515_v6 = vadd.f32 %v1023_v34, %v447_v0  ;;  %676 = vst.msk [vmem:[%s1413_s4 + $0x5c] sm:$0xf] %vm652_vm1, %v611_v60  ;;  %v484_v8 = vadd.f32 %v1023_v34, %v416_v4 }
  0xc7   :  { %v563_v9 = vmax.f32 %v499_v5, 0.0  ;;  %v532_v11 = vmax.f32 %v468_v7, 0.0 }
  0xc8   :  { %v579_v10 = vmax.f32 %v515_v6, 0.0  ;;  %v548_v12 = vmax.f32 %v484_v8, 0.0 }
  0xc9   :  { %v627_v13 = vpack.c.bf16 %v563_v9, %v563_v9  ;;  %v596_v15 = vpack.c.bf16 %v532_v11, %v532_v11 }
  0xca   :  { %v643_v14 = vpack.c.bf16 %v579_v10, %v579_v10  ;;  %v612_v16 = vpack.c.bf16 %v548_v12, %v548_v12  ;;  %v328_v17 = vpop.f32.mrf.mxu2  ;;  %v250_v21 = vpop.f32.mrf.mxu0 }
  0xcb   :  { %v368_v18 = vpop.f32.mrf.mxu3  ;;  %692 = vst.msk [vmem:[%s1413_s4 + $0x9c] sm:$0xf] %vm652_vm1, %v627_v13  ;;  %v432_v19 = vmul.f32 %v1018_v33, %v328_v17  ;;  %v290_v22 = vpop.f32.mrf.mxu1  ;;  %v401_v23 = vmul.f32 %v1018_v33, %v250_v21 }
  0xcc   :  { %v448_v20 = vmul.f32 %v1018_v33, %v368_v18  ;;  %708 = vst.msk [vmem:[%s1413_s4 + $0xdc] sm:$0xf] %vm652_vm1, %v643_v14  ;;  %v417_v24 = vmul.f32 %v1018_v33, %v290_v22 }
  0xcd   :  { %661 = vst.msk [vmem:[%s1413_s4 + $0x20] sm:$0xf] %vm652_vm1, %v596_v15  ;;  %v500_v25 = vadd.f32 %v1023_v34, %v432_v19  ;;  %v469_v27 = vadd.f32 %v1023_v34, %v401_v23 }
  0xce   :  { %v516_v26 = vadd.f32 %v1023_v34, %v448_v20  ;;  %677 = vst.msk [vmem:[%s1413_s4 + $0x60] sm:$0xf] %vm652_vm1, %v612_v16  ;;  %v485_v28 = vadd.f32 %v1023_v34, %v417_v24 }
  0xcf   :  { %v564_v29 = vmax.f32 %v500_v25, 0.0  ;;  %v533_v31 = vmax.f32 %v469_v27, 0.0 }
  0xd0   :  { %v580_v30 = vmax.f32 %v516_v26, 0.0  ;;  %v549_v32 = vmax.f32 %v485_v28, 0.0 }
  0xd1   :  { %v628_v35 = vpack.c.bf16 %v564_v29, %v564_v29  ;;  %v597_v37 = vpack.c.bf16 %v533_v31, %v533_v31 }
  0xd2   :  { %v644_v36 = vpack.c.bf16 %v580_v30, %v580_v30  ;;  %v613_v38 = vpack.c.bf16 %v549_v32, %v549_v32  ;;  %v330_v39 = vpop.f32.mrf.mxu2  ;;  %v253_v43 = vpop.f32.mrf.mxu0 }
  0xd3   :  { %v370_v40 = vpop.f32.mrf.mxu3  ;;  %693 = vst.msk [vmem:[%s1413_s4 + $0xa0] sm:$0xf] %vm652_vm1, %v628_v35  ;;  %v433_v41 = vmul.f32 %v1018_v33, %v330_v39  ;;  %v293_v44 = vpop.f32.mrf.mxu1  ;;  %v402_v45 = vmul.f32 %v1018_v33, %v253_v43 }
  0xd4   :  { %v449_v42 = vmul.f32 %v1018_v33, %v370_v40  ;;  %709 = vst.msk [vmem:[%s1413_s4 + $0xe0] sm:$0xf] %vm652_vm1, %v644_v36  ;;  %v418_v46 = vmul.f32 %v1018_v33, %v293_v44 }
  0xd5   :  { %662 = vst.msk [vmem:[%s1413_s4 + $0x24] sm:$0xf] %vm652_vm1, %v597_v37  ;;  %v501_v47 = vadd.f32 %v1023_v34, %v433_v41  ;;  %v470_v49 = vadd.f32 %v1023_v34, %v402_v45 }
  0xd6   :  { %v517_v48 = vadd.f32 %v1023_v34, %v449_v42  ;;  %678 = vst.msk [vmem:[%s1413_s4 + $0x64] sm:$0xf] %vm652_vm1, %v613_v38  ;;  %v486_v50 = vadd.f32 %v1023_v34, %v418_v46 }
  0xd7   :  { %v565_v51 = vmax.f32 %v501_v47, 0.0  ;;  %v534_v53 = vmax.f32 %v470_v49, 0.0 }
  0xd8   :  { %v581_v52 = vmax.f32 %v517_v48, 0.0  ;;  %v550_v54 = vmax.f32 %v486_v50, 0.0 }
  0xd9   :  { %v629_v55 = vpack.c.bf16 %v565_v51, %v565_v51  ;;  %v598_v57 = vpack.c.bf16 %v534_v53, %v534_v53 }
  0xda   :  { %v645_v56 = vpack.c.bf16 %v581_v52, %v581_v52  ;;  %v614_v58 = vpack.c.bf16 %v550_v54, %v550_v54  ;;  %v333_v59 = vpop.f32.mrf.mxu2  ;;  %v255_v63 = vpop.f32.mrf.mxu0 }
  0xdb   :  { %v373_v60 = vpop.f32.mrf.mxu3  ;;  %694 = vst.msk [vmem:[%s1413_s4 + $0xa4] sm:$0xf] %vm652_vm1, %v629_v55  ;;  %v434_v61 = vmul.f32 %v1018_v33, %v333_v59  ;;  %v295_v0 = vpop.f32.mrf.mxu1  ;;  %v403_v1 = vmul.f32 %v1018_v33, %v255_v63 }
  0xdc   :  { %v450_v62 = vmul.f32 %v1018_v33, %v373_v60  ;;  %710 = vst.msk [vmem:[%s1413_s4 + $0xe4] sm:$0xf] %vm652_vm1, %v645_v56  ;;  %v419_v2 = vmul.f32 %v1018_v33, %v295_v0 }
  0xdd   :  { %663 = vst.msk [vmem:[%s1413_s4 + $0x28] sm:$0xf] %vm652_vm1, %v598_v57  ;;  %v502_v3 = vadd.f32 %v1023_v34, %v434_v61  ;;  %v471_v5 = vadd.f32 %v1023_v34, %v403_v1 }
  0xde   :  { %v518_v4 = vadd.f32 %v1023_v34, %v450_v62  ;;  %679 = vst.msk [vmem:[%s1413_s4 + $0x68] sm:$0xf] %vm652_vm1, %v614_v58  ;;  %v487_v6 = vadd.f32 %v1023_v34, %v419_v2 }
  0xdf   :  { %v566_v7 = vmax.f32 %v502_v3, 0.0  ;;  %v535_v9 = vmax.f32 %v471_v5, 0.0 }
  0xe0   :  { %v582_v8 = vmax.f32 %v518_v4, 0.0  ;;  %v551_v10 = vmax.f32 %v487_v6, 0.0 }
  0xe1   :  { %v630_v11 = vpack.c.bf16 %v566_v7, %v566_v7  ;;  %v599_v13 = vpack.c.bf16 %v535_v9, %v535_v9 }
  0xe2   :  { %v646_v12 = vpack.c.bf16 %v582_v8, %v582_v8  ;;  %v615_v14 = vpack.c.bf16 %v551_v10, %v551_v10  ;;  %v335_v15 = vpop.f32.mrf.mxu2  ;;  %v258_v19 = vpop.f32.mrf.mxu0 }
  0xe3   :  { %v375_v16 = vpop.f32.mrf.mxu3  ;;  %695 = vst.msk [vmem:[%s1413_s4 + $0xa8] sm:$0xf] %vm652_vm1, %v630_v11  ;;  %v435_v17 = vmul.f32 %v1018_v33, %v335_v15  ;;  %v298_v20 = vpop.f32.mrf.mxu1  ;;  %v404_v21 = vmul.f32 %v1018_v33, %v258_v19 }
  0xe4   :  { %v451_v18 = vmul.f32 %v1018_v33, %v375_v16  ;;  %711 = vst.msk [vmem:[%s1413_s4 + $0xe8] sm:$0xf] %vm652_vm1, %v646_v12  ;;  %v420_v22 = vmul.f32 %v1018_v33, %v298_v20 }
  0xe5   :  { %664 = vst.msk [vmem:[%s1413_s4 + $0x2c] sm:$0xf] %vm652_vm1, %v599_v13  ;;  %v503_v23 = vadd.f32 %v1023_v34, %v435_v17  ;;  %v472_v25 = vadd.f32 %v1023_v34, %v404_v21 }
  0xe6   :  { %v519_v24 = vadd.f32 %v1023_v34, %v451_v18  ;;  %680 = vst.msk [vmem:[%s1413_s4 + $0x6c] sm:$0xf] %vm652_vm1, %v615_v14  ;;  %v488_v26 = vadd.f32 %v1023_v34, %v420_v22 }
  0xe7   :  { %v567_v27 = vmax.f32 %v503_v23, 0.0  ;;  %v536_v29 = vmax.f32 %v472_v25, 0.0 }
  0xe8   :  { %v583_v28 = vmax.f32 %v519_v24, 0.0  ;;  %v552_v30 = vmax.f32 %v488_v26, 0.0 }
  0xe9   :  { %v631_v31 = vpack.c.bf16 %v567_v27, %v567_v27  ;;  %v600_v35 = vpack.c.bf16 %v536_v29, %v536_v29 }
  0xea   :  { %v647_v32 = vpack.c.bf16 %v583_v28, %v583_v28  ;;  %v616_v36 = vpack.c.bf16 %v552_v30, %v552_v30  ;;  %v338_v37 = vpop.f32.mrf.mxu2  ;;  %v260_v41 = vpop.f32.mrf.mxu0 }
  0xeb   :  { %v378_v38 = vpop.f32.mrf.mxu3  ;;  %696 = vst.msk [vmem:[%s1413_s4 + $0xac] sm:$0xf] %vm652_vm1, %v631_v31  ;;  %v436_v39 = vmul.f32 %v1018_v33, %v338_v37  ;;  %v300_v42 = vpop.f32.mrf.mxu1  ;;  %v405_v43 = vmul.f32 %v1018_v33, %v260_v41 }
  0xec   :  { %v452_v40 = vmul.f32 %v1018_v33, %v378_v38  ;;  %712 = vst.msk [vmem:[%s1413_s4 + $0xec] sm:$0xf] %vm652_vm1, %v647_v32  ;;  %v421_v44 = vmul.f32 %v1018_v33, %v300_v42 }
  0xed   :  { %665 = vst.msk [vmem:[%s1413_s4 + $0x30] sm:$0xf] %vm652_vm1, %v600_v35  ;;  %v504_v45 = vadd.f32 %v1023_v34, %v436_v39  ;;  %v473_v47 = vadd.f32 %v1023_v34, %v405_v43 }
  0xee   :  { %v520_v46 = vadd.f32 %v1023_v34, %v452_v40  ;;  %681 = vst.msk [vmem:[%s1413_s4 + $0x70] sm:$0xf] %vm652_vm1, %v616_v36  ;;  %v489_v48 = vadd.f32 %v1023_v34, %v421_v44 }
  0xef   :  { %v568_v49 = vmax.f32 %v504_v45, 0.0  ;;  %v537_v51 = vmax.f32 %v473_v47, 0.0 }
  0xf0   :  { %v584_v50 = vmax.f32 %v520_v46, 0.0  ;;  %v553_v52 = vmax.f32 %v489_v48, 0.0 }
  0xf1   :  { %v632_v53 = vpack.c.bf16 %v568_v49, %v568_v49  ;;  %v601_v55 = vpack.c.bf16 %v537_v51, %v537_v51 }
  0xf2   :  { %v648_v54 = vpack.c.bf16 %v584_v50, %v584_v50  ;;  %v617_v56 = vpack.c.bf16 %v553_v52, %v553_v52  ;;  %v340_v57 = vpop.f32.mrf.mxu2  ;;  %v263_v61 = vpop.f32.mrf.mxu0 }
  0xf3   :  { %v380_v58 = vpop.f32.mrf.mxu3  ;;  %697 = vst.msk [vmem:[%s1413_s4 + $0xb0] sm:$0xf] %vm652_vm1, %v632_v53  ;;  %v437_v59 = vmul.f32 %v1018_v33, %v340_v57  ;;  %v303_v62 = vpop.f32.mrf.mxu1  ;;  %v406_v63 = vmul.f32 %v1018_v33, %v263_v61 }
  0xf4   :  { %v453_v60 = vmul.f32 %v1018_v33, %v380_v58  ;;  %713 = vst.msk [vmem:[%s1413_s4 + $0xf0] sm:$0xf] %vm652_vm1, %v648_v54  ;;  %v422_v0 = vmul.f32 %v1018_v33, %v303_v62 }
  0xf5   :  { %666 = vst.msk [vmem:[%s1413_s4 + $0x34] sm:$0xf] %vm652_vm1, %v601_v55  ;;  %v505_v1 = vadd.f32 %v1023_v34, %v437_v59  ;;  %v474_v3 = vadd.f32 %v1023_v34, %v406_v63 }
  0xf6   :  { %v521_v2 = vadd.f32 %v1023_v34, %v453_v60  ;;  %682 = vst.msk [vmem:[%s1413_s4 + $0x74] sm:$0xf] %vm652_vm1, %v617_v56  ;;  %v490_v4 = vadd.f32 %v1023_v34, %v422_v0 }
  0xf7   :  { %v569_v5 = vmax.f32 %v505_v1, 0.0  ;;  %v538_v7 = vmax.f32 %v474_v3, 0.0 }
  0xf8   :  { %v585_v6 = vmax.f32 %v521_v2, 0.0  ;;  %v554_v8 = vmax.f32 %v490_v4, 0.0 }
  0xf9   :  { %v633_v9 = vpack.c.bf16 %v569_v5, %v569_v5  ;;  %v602_v11 = vpack.c.bf16 %v538_v7, %v538_v7 }
  0xfa   :  { %v649_v10 = vpack.c.bf16 %v585_v6, %v585_v6  ;;  %v618_v12 = vpack.c.bf16 %v554_v8, %v554_v8  ;;  %v343_v13 = vpop.f32.mrf.mxu2  ;;  %v265_v17 = vpop.f32.mrf.mxu0 }
  0xfb   :  { %v383_v14 = vpop.f32.mrf.mxu3  ;;  %698 = vst.msk [vmem:[%s1413_s4 + $0xb4] sm:$0xf] %vm652_vm1, %v633_v9  ;;  %v438_v15 = vmul.f32 %v1018_v33, %v343_v13  ;;  %v305_v18 = vpop.f32.mrf.mxu1  ;;  %v407_v19 = vmul.f32 %v1018_v33, %v265_v17 }
  0xfc   :  { %v454_v16 = vmul.f32 %v1018_v33, %v383_v14  ;;  %714 = vst.msk [vmem:[%s1413_s4 + $0xf4] sm:$0xf] %vm652_vm1, %v649_v10  ;;  %v423_v20 = vmul.f32 %v1018_v33, %v305_v18 }
  0xfd   :  { %667 = vst.msk [vmem:[%s1413_s4 + $0x38] sm:$0xf] %vm652_vm1, %v602_v11  ;;  %v506_v21 = vadd.f32 %v1023_v34, %v438_v15  ;;  %v475_v23 = vadd.f32 %v1023_v34, %v407_v19 }
  0xfe   :  { %v522_v22 = vadd.f32 %v1023_v34, %v454_v16  ;;  %683 = vst.msk [vmem:[%s1413_s4 + $0x78] sm:$0xf] %vm652_vm1, %v618_v12  ;;  %v491_v24 = vadd.f32 %v1023_v34, %v423_v20 }
  0xff   :  { %v570_v25 = vmax.f32 %v506_v21, 0.0  ;;  %v539_v27 = vmax.f32 %v475_v23, 0.0 }
 0x100   :  { %v586_v26 = vmax.f32 %v522_v22, 0.0  ;;  %v555_v28 = vmax.f32 %v491_v24, 0.0 }
 0x101   :  { %v634_v29 = vpack.c.bf16 %v570_v25, %v570_v25  ;;  %v603_v31 = vpack.c.bf16 %v539_v27, %v539_v27 }
 0x102   :  { %v650_v30 = vpack.c.bf16 %v586_v26, %v586_v26  ;;  %v619_v32 = vpack.c.bf16 %v555_v28, %v555_v28  ;;  %v345_v35 = vpop.f32.mrf.mxu2 }
 0x103   :  { %v385_v36 = vpop.f32.mrf.mxu3  ;;  %699 = vst.msk [vmem:[%s1413_s4 + $0xb8] sm:$0xf] %vm652_vm1, %v634_v29  ;;  %v439_v37 = vmul.f32 %v1018_v33, %v345_v35 }
 0x104   :  { %v455_v38 = vmul.f32 %v1018_v33, %v385_v36  ;;  %715 = vst.msk [vmem:[%s1413_s4 + $0xf8] sm:$0xf] %vm652_vm1, %v650_v30 }
 0x105   :  { %668 = vst.msk [vmem:[%s1413_s4 + $0x3c] sm:$0xf] %vm652_vm1, %v603_v31  ;;  %v507_v39 = vadd.f32 %v1023_v34, %v439_v37 }
 0x106   :  { %v523_v40 = vadd.f32 %v1023_v34, %v455_v38  ;;  %684 = vst.msk [vmem:[%s1413_s4 + $0x7c] sm:$0xf] %vm652_vm1, %v619_v32 }
 0x107   :  { %v571_v33 = vmax.f32 %v507_v39, 0.0 }
 0x108   :  { %v587_v41 = vmax.f32 %v523_v40, 0.0 }
 0x109   :  { %v635_v42 = vpack.c.bf16 %v571_v33, %v571_v33 }
 0x10a   :  { %v651_v43 = vpack.c.bf16 %v587_v41, %v587_v41 }
 0x10b   :  { %700 = vst.msk [vmem:[%s1413_s4 + $0xbc] sm:$0xf] %vm652_vm1, %v635_v42 }
 0x10c   :  { %716 = vst.msk [vmem:[%s1413_s4 + $0xfc] sm:$0xf] %vm652_vm1, %v651_v43 }

</bundles_post_ra>
